<compile_context>
chip_gen: v5e
topology: v5e:2x2
jax: 0.10.0
libtpu: 0.0.40
codegen_flags: <defaults>
</compile_context>

<pallas_src>
import functools
import math

import jax
import jax.numpy as jnp
from jax.experimental import pallas as pl
from jax.experimental.pallas import tpu as pltpu

_LANE = 128
_SUBLANE = 8
_LOG_2PI = math.log(2.0 * math.pi)
_LOG_2 = math.log(2.0)


def _round_up(x, m):
    return ((x + m - 1) // m) * m


def _softplus(x):
    # numerically stable softplus: max(x,0) + log1p(exp(-|x|))  (VPU + EUP)
    return jnp.maximum(x, 0.0) + jnp.log1p(jnp.exp(-jnp.abs(x)))


def _policy_kernel(n_hidden, a_pad, *refs):
    # refs: state, (w_i, b_i)*n_hidden, w_head, b_head, eps, out
    idx = 0
    x_ref = refs[idx]; idx += 1
    hidden_refs = []
    for _ in range(n_hidden):
        hidden_refs.append((refs[idx], refs[idx + 1]))
        idx += 2
    w_head_ref, b_head_ref = refs[idx], refs[idx + 1]; idx += 2
    eps_ref = refs[idx]; idx += 1
    out_ref = refs[idx]; idx += 1

    h = x_ref[...]                                       # f32 [TB, S_pad]
    # hidden MLP blocks: bf16-operand MXU matmul (f32 accumulate) + f32 ReLU
    for w_ref, b_ref in hidden_refs:
        h = jnp.dot(h.astype(jnp.bfloat16), w_ref[...],
                    preferred_element_type=jnp.float32) + b_ref[...]
        h = jnp.maximum(h, 0.0)

    # fused mu/std head: one lane-dense MXU pass -> [TB, 2*A_pad]
    head = jnp.dot(h.astype(jnp.bfloat16), w_head_ref[...],
                   preferred_element_type=jnp.float32) + b_head_ref[...]
    mu = head[:, :a_pad]            # 128-aligned slices (no masked lane ops)
    pre_std = head[:, a_pad:]

    std = _softplus(pre_std)
    eps = eps_ref[...]
    action = mu + std * eps

    # Normal(mu, std).log_prob(action), using (action - mu)/std == eps
    log_prob = -0.5 * eps * eps - jnp.log(std) - 0.5 * _LOG_2PI

    t = jnp.tanh(action)
    # log(1 - tanh(a)^2) == 2*(log 2 - a - softplus(-2a))   (exact & stable;
    # replaces the reference's +1e-7 saturation hack)
    log1m_t2 = 2.0 * (_LOG_2 - action - _softplus(-2.0 * action))
    real_log_prob = log_prob - log1m_t2

    # single lane-dense output slab [t | real_log_prob]; both sub-stores are
    # 128-lane aligned -> unmasked vst.
    out_ref[:, :a_pad] = t
    out_ref[:, a_pad:] = real_log_prob


def init_policy_params(key, state_size, action_size, hidden_layers):
    """PyTorch nn.Linear-style init: U(-1/sqrt(fan_in), 1/sqrt(fan_in))."""
    params = {"hidden": [], "mu": None, "std": None}
    in_c = state_size
    for h in hidden_layers:
        key, kw, kb = jax.random.split(key, 3)
        bound = 1.0 / math.sqrt(in_c)
        w = jax.random.uniform(kw, (in_c, h), jnp.float32, -bound, bound)
        b = jax.random.uniform(kb, (h,), jnp.float32, -bound, bound)
        params["hidden"].append((w, b))
        in_c = h
    for name in ("mu", "std"):
        key, kw, kb = jax.random.split(key, 3)
        bound = 1.0 / math.sqrt(in_c)
        w = jax.random.uniform(kw, (in_c, action_size), jnp.float32, -bound, bound)
        b = jax.random.uniform(kb, (action_size,), jnp.float32, -bound, bound)
        params[name] = (w, b)
    return params


def prepare_padded_params(params, matmul_dtype=jnp.bfloat16):
    """Pad all feature dims up to multiples of 128, fuse mu/std heads into one
    [in_pad, 2*A_pad] weight, and cast matmul operands to bf16 (biases stay
    f32; accumulation is f32 in-kernel). Do this once, outside the hot path."""
    padded_hidden = []
    for w, b in params["hidden"]:
        in_c, out_c = w.shape
        in_p, out_p = _round_up(in_c, _LANE), _round_up(out_c, _LANE)
        wp = jnp.zeros((in_p, out_p), jnp.float32).at[:in_c, :out_c].set(w)
        bp = jnp.zeros((1, out_p), jnp.float32).at[0, :out_c].set(b)
        padded_hidden.append((wp.astype(matmul_dtype), bp))

    w_mu, b_mu = params["mu"]
    w_std, b_std = params["std"]
    in_c, a = w_mu.shape
    in_p = _round_up(in_c, _LANE)
    a_pad = _round_up(a, _LANE)
    w_head = jnp.zeros((in_p, 2 * a_pad), jnp.float32)
    w_head = w_head.at[:in_c, :a].set(w_mu)
    w_head = w_head.at[:in_c, a_pad:a_pad + a].set(w_std)
    b_head = jnp.zeros((1, 2 * a_pad), jnp.float32)
    b_head = b_head.at[0, :a].set(b_mu)
    b_head = b_head.at[0, a_pad:a_pad + a].set(b_std)

    state_pad = padded_hidden[0][0].shape[0] if padded_hidden else in_p
    return {
        "hidden": padded_hidden,
        "head_w": w_head.astype(matmul_dtype),
        "head_b": b_head,
        "action_size": a,
        "a_pad": a_pad,
        "state_pad": state_pad,
    }


def policy_net_forward(state, eps, padded_params, *, batch_tile=256):
    """Runs the whole PolicyNet forward inside one batch-tiled Pallas kernel."""
    n_hidden = len(padded_params["hidden"])
    a = padded_params["action_size"]
    a_pad = padded_params["a_pad"]
    s_pad = padded_params["state_pad"]

    B, S = state.shape
    # batch tile: one block for small B, 256-row tiles (streamed + megacore
    # parallel) for large B.
    tb = batch_tile if B >= batch_tile else _round_up(B, _SUBLANE)
    b_pad = _round_up(B, tb)

    state_p = jnp.zeros((b_pad, s_pad), jnp.float32).at[:B, :S].set(state)
    eps_p = jnp.zeros((b_pad, a_pad), jnp.float32).at[:B, :a].set(eps)

    inputs = [state_p]
    in_specs = [pl.BlockSpec((tb, s_pad), lambda i: (i, 0))]
    for w, b in padded_params["hidden"]:
        inputs += [w, b]
        # weights/biases: constant index_map -> VMEM-resident across grid steps
        in_specs += [pl.BlockSpec(w.shape, lambda i: (0, 0)),
                     pl.BlockSpec(b.shape, lambda i: (0, 0))]
    inputs += [padded_params["head_w"], padded_params["head_b"], eps_p]
    in_specs += [pl.BlockSpec(padded_params["head_w"].shape, lambda i: (0, 0)),
                 pl.BlockSpec(padded_params["head_b"].shape, lambda i: (0, 0)),
                 pl.BlockSpec((tb, a_pad), lambda i: (i, 0))]

    out_spec = pl.BlockSpec((tb, 2 * a_pad), lambda i: (i, 0))
    out_shape = jax.ShapeDtypeStruct((b_pad, 2 * a_pad), jnp.float32)

    # advisory cost estimate for XLA's scheduler
    flops = 0
    for w, _ in padded_params["hidden"]:
        flops += 2 * b_pad * int(w.shape[0]) * int(w.shape[1])
    flops += 2 * b_pad * int(padded_params["head_w"].shape[0]) \
        * int(padded_params["head_w"].shape[1])
    transcendentals = 6 * b_pad * a_pad  # exp, log1p, log, tanh, exp, log1p
    bytes_accessed = sum(int(x.size) * int(x.dtype.itemsize) for x in inputs) \
        + b_pad * 2 * a_pad * 4

    kernel = functools.partial(_policy_kernel, n_hidden, a_pad)
    out = pl.pallas_call(
        kernel,
        grid=(b_pad // tb,),
        in_specs=in_specs,
        out_specs=out_spec,
        out_shape=out_shape,
        compiler_params=pltpu.CompilerParams(
            dimension_semantics=("parallel",)),
        cost_estimate=pl.CostEstimate(
            flops=flops,
            transcendentals=transcendentals,
            bytes_accessed=bytes_accessed),
    )(*inputs)

    real_action = out[:B, :a]
    real_log_prob = out[:B, a_pad:a_pad + a]
    return real_action, real_log_prob


def policy_net_reference(state, eps, params):
    """Pure-JAX f32 reference with the torch module's math (incl. 1e-7 hack)."""
    h = state
    for w, b in params["hidden"]:
        h = jnp.maximum(jnp.dot(h, w) + b, 0.0)
    mu = jnp.dot(h, params["mu"][0]) + params["mu"][1]
    std = jax.nn.softplus(jnp.dot(h, params["std"][0]) + params["std"][1])
    action = mu + std * eps
    log_prob = -0.5 * eps * eps - jnp.log(std) - 0.5 * _LOG_2PI
    t = jnp.tanh(action)
    real_log_prob = log_prob - jnp.log(1.0 - t * t + 1e-07)
    return t, real_log_prob


if __name__ == "__main__":
    # Small shapes consistent with the module's forward:
    #   state: [batch, state_size], outputs: [batch, action_size]
    batch = 8
    state_size = 16
    hidden_layers = [32, 32]
    action_size = 8

    key = jax.random.PRNGKey(0)
    k_params, k_state, k_eps = jax.random.split(key, 3)

    params = init_policy_params(k_params, state_size, action_size, hidden_layers)
    padded = prepare_padded_params(params)

    state = jax.random.normal(k_state, (batch, state_size), jnp.float32)
    eps = jax.random.normal(k_eps, (batch, action_size), jnp.float32)

    real_action, real_log_prob = policy_net_forward(state, eps, padded)
    jax.block_until_ready((real_action, real_log_prob))

    ref_action, ref_log_prob = policy_net_reference(state, eps, params)

    assert real_action.shape == (batch, action_size)
    assert real_log_prob.shape == (batch, action_size)
    assert bool(jnp.all(jnp.isfinite(real_action)))
    assert bool(jnp.all(jnp.isfinite(real_log_prob)))
    # bf16 MXU operands (f32 accumulation) -> loose elementwise tolerance
    assert float(jnp.max(jnp.abs(real_action - ref_action))) < 1e-1
    assert float(jnp.max(jnp.abs(real_log_prob - ref_log_prob))) < 1e-1
    print("KERNEL_OK")
</pallas_src>

<mosaic_0001>
module attributes {stable_mosaic.version = 11 : i64} {
  func.func @_policy_kernel(%arg0: i32, %arg1: memref<8x128xf32, #tpu.memory_space<vmem>>, %arg2: memref<128x128xbf16, #tpu.memory_space<vmem>>, %arg3: memref<1x128xf32, #tpu.memory_space<vmem>>, %arg4: memref<128x128xbf16, #tpu.memory_space<vmem>>, %arg5: memref<1x128xf32, #tpu.memory_space<vmem>>, %arg6: memref<128x256xbf16, #tpu.memory_space<vmem>>, %arg7: memref<1x256xf32, #tpu.memory_space<vmem>>, %arg8: memref<8x128xf32, #tpu.memory_space<vmem>>, %arg9: memref<8x256xf32, #tpu.memory_space<vmem>>) attributes {dimension_semantics = [#tpu.dimension_semantics<parallel>], iteration_bounds = array<i64: 1>, scalar_prefetch = 0 : i64, scratch_operands = 0 : i64, tpu.core_type = #tpu.core_type<tc>, window_params = [{transform_indices = @transform_0, window_bounds = array<i64: 8, 128>}, {pipeline_mode = #tpu.pipeline_mode<synchronous>, transform_indices = @transform_1, window_bounds = array<i64: 128, 128>}, {pipeline_mode = #tpu.pipeline_mode<synchronous>, transform_indices = @transform_2, window_bounds = array<i64: 1, 128>}, {pipeline_mode = #tpu.pipeline_mode<synchronous>, transform_indices = @transform_3, window_bounds = array<i64: 128, 128>}, {pipeline_mode = #tpu.pipeline_mode<synchronous>, transform_indices = @transform_4, window_bounds = array<i64: 1, 128>}, {pipeline_mode = #tpu.pipeline_mode<synchronous>, transform_indices = @transform_5, window_bounds = array<i64: 128, 256>}, {pipeline_mode = #tpu.pipeline_mode<synchronous>, transform_indices = @transform_6, window_bounds = array<i64: 1, 256>}, {transform_indices = @transform_7, window_bounds = array<i64: 8, 128>}, {transform_indices = @transform_8, window_bounds = array<i64: 8, 256>}]} {
    %c0 = arith.constant 0 : index
    %c0_0 = arith.constant 0 : index
    %0 = vector.load %arg1[%c0, %c0_0] : memref<8x128xf32, #tpu.memory_space<vmem>>, vector<8x128xf32>
    %1 = arith.truncf %0 : vector<8x128xf32> to vector<8x128xbf16>
    %c0_1 = arith.constant 0 : index
    %c0_2 = arith.constant 0 : index
    %2 = vector.load %arg2[%c0_1, %c0_2] : memref<128x128xbf16, #tpu.memory_space<vmem>>, vector<128x128xbf16>
    %cst = arith.constant dense<0.000000e+00> : vector<8x128xf32>
    %3 = tpu.matmul %1, %2, %cst {dimension_numbers = #tpu.dot_dimension_numbers<[1], [0], [0], [1], [0, 0, 1, 1], [], []>} : vector<8x128xbf16>, vector<128x128xbf16>, vector<8x128xf32> -> vector<8x128xf32>
    %c0_3 = arith.constant 0 : index
    %c0_4 = arith.constant 0 : index
    %4 = vector.load %arg3[%c0_3, %c0_4] : memref<1x128xf32, #tpu.memory_space<vmem>>, vector<1x128xf32>
    %5 = vector.broadcast %4 : vector<1x128xf32> to vector<8x128xf32>
    %6 = arith.addf %3, %5 : vector<8x128xf32>
    %cst_5 = arith.constant 0.000000e+00 : f32
    %7 = vector.broadcast %cst_5 : f32 to vector<8x128xf32>
    %8 = arith.maximumf %6, %7 : vector<8x128xf32>
    %9 = arith.truncf %8 : vector<8x128xf32> to vector<8x128xbf16>
    %c0_6 = arith.constant 0 : index
    %c0_7 = arith.constant 0 : index
    %10 = vector.load %arg4[%c0_6, %c0_7] : memref<128x128xbf16, #tpu.memory_space<vmem>>, vector<128x128xbf16>
    %cst_8 = arith.constant dense<0.000000e+00> : vector<8x128xf32>
    %11 = tpu.matmul %9, %10, %cst_8 {dimension_numbers = #tpu.dot_dimension_numbers<[1], [0], [0], [1], [0, 0, 1, 1], [], []>} : vector<8x128xbf16>, vector<128x128xbf16>, vector<8x128xf32> -> vector<8x128xf32>
    %c0_9 = arith.constant 0 : index
    %c0_10 = arith.constant 0 : index
    %12 = vector.load %arg5[%c0_9, %c0_10] : memref<1x128xf32, #tpu.memory_space<vmem>>, vector<1x128xf32>
    %13 = vector.broadcast %12 : vector<1x128xf32> to vector<8x128xf32>
    %14 = arith.addf %11, %13 : vector<8x128xf32>
    %cst_11 = arith.constant 0.000000e+00 : f32
    %15 = vector.broadcast %cst_11 : f32 to vector<8x128xf32>
    %16 = arith.maximumf %14, %15 : vector<8x128xf32>
    %17 = arith.truncf %16 : vector<8x128xf32> to vector<8x128xbf16>
    %c0_12 = arith.constant 0 : index
    %c0_13 = arith.constant 0 : index
    %18 = vector.load %arg6[%c0_12, %c0_13] : memref<128x256xbf16, #tpu.memory_space<vmem>>, vector<128x256xbf16>
    %cst_14 = arith.constant dense<0.000000e+00> : vector<8x256xf32>
    %19 = tpu.matmul %17, %18, %cst_14 {dimension_numbers = #tpu.dot_dimension_numbers<[1], [0], [0], [1], [0, 0, 1, 1], [], []>} : vector<8x128xbf16>, vector<128x256xbf16>, vector<8x256xf32> -> vector<8x256xf32>
    %c0_15 = arith.constant 0 : index
    %c0_16 = arith.constant 0 : index
    %20 = vector.load %arg7[%c0_15, %c0_16] : memref<1x256xf32, #tpu.memory_space<vmem>>, vector<1x256xf32>
    %21 = vector.broadcast %20 : vector<1x256xf32> to vector<8x256xf32>
    %22 = arith.addf %19, %21 : vector<8x256xf32>
    %23 = vector.extract_strided_slice %22 {offsets = [0, 0], sizes = [8, 128], strides = [1, 1]} : vector<8x256xf32> to vector<8x128xf32>
    %24 = vector.extract_strided_slice %22 {offsets = [0, 128], sizes = [8, 128], strides = [1, 1]} : vector<8x256xf32> to vector<8x128xf32>
    %cst_17 = arith.constant 0.000000e+00 : f32
    %25 = vector.broadcast %cst_17 : f32 to vector<8x128xf32>
    %26 = arith.maximumf %24, %25 : vector<8x128xf32>
    %27 = math.absf %24 : vector<8x128xf32>
    %cst_18 = arith.constant 0.000000e+00 : f32
    %28 = vector.broadcast %cst_18 : f32 to vector<8x128xf32>
    %29 = arith.subf %28, %27 : vector<8x128xf32>
    %30 = math.exp %29 : vector<8x128xf32>
    %31 = math.log1p %30 : vector<8x128xf32>
    %32 = arith.addf %26, %31 : vector<8x128xf32>
    %c0_19 = arith.constant 0 : index
    %c0_20 = arith.constant 0 : index
    %33 = vector.load %arg8[%c0_19, %c0_20] : memref<8x128xf32, #tpu.memory_space<vmem>>, vector<8x128xf32>
    %34 = arith.mulf %32, %33 : vector<8x128xf32>
    %35 = arith.addf %23, %34 : vector<8x128xf32>
    %cst_21 = arith.constant -5.000000e-01 : f32
    %36 = vector.broadcast %cst_21 : f32 to vector<8x128xf32>
    %37 = arith.mulf %36, %33 : vector<8x128xf32>
    %38 = arith.mulf %37, %33 : vector<8x128xf32>
    %39 = math.log %32 : vector<8x128xf32>
    %40 = arith.subf %38, %39 : vector<8x128xf32>
    %cst_22 = arith.constant 0.918938517 : f32
    %41 = vector.broadcast %cst_22 : f32 to vector<8x128xf32>
    %42 = arith.subf %40, %41 : vector<8x128xf32>
    %43 = math.tanh %35 : vector<8x128xf32>
    %cst_23 = arith.constant 0.693147182 : f32
    %44 = vector.broadcast %cst_23 : f32 to vector<8x128xf32>
    %45 = arith.subf %44, %35 : vector<8x128xf32>
    %cst_24 = arith.constant -2.000000e+00 : f32
    %46 = vector.broadcast %cst_24 : f32 to vector<8x128xf32>
    %47 = arith.mulf %46, %35 : vector<8x128xf32>
    %cst_25 = arith.constant 0.000000e+00 : f32
    %48 = vector.broadcast %cst_25 : f32 to vector<8x128xf32>
    %49 = arith.maximumf %47, %48 : vector<8x128xf32>
    %50 = math.absf %47 : vector<8x128xf32>
    %cst_26 = arith.constant 0.000000e+00 : f32
    %51 = vector.broadcast %cst_26 : f32 to vector<8x128xf32>
    %52 = arith.subf %51, %50 : vector<8x128xf32>
    %53 = math.exp %52 : vector<8x128xf32>
    %54 = math.log1p %53 : vector<8x128xf32>
    %55 = arith.addf %49, %54 : vector<8x128xf32>
    %56 = arith.subf %45, %55 : vector<8x128xf32>
    %cst_27 = arith.constant 2.000000e+00 : f32
    %57 = vector.broadcast %cst_27 : f32 to vector<8x128xf32>
    %58 = arith.mulf %57, %56 : vector<8x128xf32>
    %59 = arith.subf %42, %58 : vector<8x128xf32>
    %c0_28 = arith.constant 0 : index
    %c0_29 = arith.constant 0 : index
    %60 = vector.load %arg9[%c0_28, %c0_29] : memref<8x256xf32, #tpu.memory_space<vmem>>, vector<8x128xf32>
    tpu.vector_store %arg9[%c0_28, %c0_29], %43 {strides = array<i32>} : memref<8x256xf32, #tpu.memory_space<vmem>>, vector<8x128xf32>,
    %c0_30 = arith.constant 0 : index
    %c128 = arith.constant 128 : index
    %61 = vector.load %arg9[%c0_30, %c128] : memref<8x256xf32, #tpu.memory_space<vmem>>, vector<8x128xf32>
    tpu.vector_store %arg9[%c0_30, %c128], %59 {strides = array<i32>} : memref<8x256xf32, #tpu.memory_space<vmem>>, vector<8x128xf32>,
    return
  }
  func.func @transform_0(%arg0: i32) -> (i32, i32) {
    %c0_i32 = arith.constant 0 : i32
    %c0_i32_0 = arith.constant 0 : i32
    return %arg0, %c0_i32 : i32, i32
  }
  func.func @transform_1(%arg0: i32) -> (i32, i32) {
    %c0_i32 = arith.constant 0 : i32
    %c0_i32_0 = arith.constant 0 : i32
    %c0_i32_1 = arith.constant 0 : i32
    return %c0_i32, %c0_i32_0 : i32, i32
  }
  func.func @transform_2(%arg0: i32) -> (i32, i32) {
    %c0_i32 = arith.constant 0 : i32
    %c0_i32_0 = arith.constant 0 : i32
    %c0_i32_1 = arith.constant 0 : i32
    return %c0_i32, %c0_i32_0 : i32, i32
  }
  func.func @transform_3(%arg0: i32) -> (i32, i32) {
    %c0_i32 = arith.constant 0 : i32
    %c0_i32_0 = arith.constant 0 : i32
    %c0_i32_1 = arith.constant 0 : i32
    return %c0_i32, %c0_i32_0 : i32, i32
  }
  func.func @transform_4(%arg0: i32) -> (i32, i32) {
    %c0_i32 = arith.constant 0 : i32
    %c0_i32_0 = arith.constant 0 : i32
    %c0_i32_1 = arith.constant 0 : i32
    return %c0_i32, %c0_i32_0 : i32, i32
  }
  func.func @transform_5(%arg0: i32) -> (i32, i32) {
    %c0_i32 = arith.constant 0 : i32
    %c0_i32_0 = arith.constant 0 : i32
    %c0_i32_1 = arith.constant 0 : i32
    return %c0_i32, %c0_i32_0 : i32, i32
  }
  func.func @transform_6(%arg0: i32) -> (i32, i32) {
    %c0_i32 = arith.constant 0 : i32
    %c0_i32_0 = arith.constant 0 : i32
    %c0_i32_1 = arith.constant 0 : i32
    return %c0_i32, %c0_i32_0 : i32, i32
  }
  func.func @transform_7(%arg0: i32) -> (i32, i32) {
    %c0_i32 = arith.constant 0 : i32
    %c0_i32_0 = arith.constant 0 : i32
    return %arg0, %c0_i32 : i32, i32
  }
  func.func @transform_8(%arg0: i32) -> (i32, i32) {
    %c0_i32 = arith.constant 0 : i32
    %c0_i32_0 = arith.constant 0 : i32
    return %arg0, %c0_i32 : i32, i32
  }
}

</mosaic_0001>

<bundles_post_ra>
// kernel: tpu_custom_call.1
= control target key start
LH: loop header
LB: loop body
LE: loop exit
PB: predicated region body
PF: predicated region fallthrough
CT: control target
= control target key end

     0   :  { %13 = vsyncpa [#allocation3], 0  ;;  %s928_s0 = inlined_call_operand.hbm [shape: f32[8,128], index: 0, kind: input, shape index: {}]   ;;  %s929_s1 = inlined_call_operand.hbm [shape: bf16[128,128], index: 1, kind: input, shape index: {}]   ;;  %s930_s2 = inlined_call_operand.vmem [shape: f32[1,128], index: 2, kind: input, shape index: {}]   ;;  %s931_s3 = inlined_call_operand.hbm [shape: bf16[128,128], index: 3, kind: input, shape index: {}]   ;;  %s932_s4 = inlined_call_operand.hbm [shape: f32[1,128], index: 4, kind: input, shape index: {}]   ;;  %s933_s5 = inlined_call_operand.hbm [shape: bf16[128,256], index: 5, kind: input, shape index: {}]   ;;  %s934_s6 = inlined_call_operand.vmem [shape: f32[1,256], index: 6, kind: input, shape index: {}]   ;;  %s935_s7 = inlined_call_operand.hbm [shape: f32[8,128], index: 7, kind: input, shape index: {}]   ;;  %s936_s8 = inlined_call_operand.hbm [shape: f32[8,256], index: 8, kind: output, shape index: {}]  }
   0x1   :  { %14 = vsyncpa [#allocation6], 0 }
   0x2   :  { %15 = vsyncpa [#allocation9], 0 }
   0x3   :  { %16 = vsyncpa [#allocation12], 0  ;;  %s33_s29 = sshll.u32 %s929_s1, 4  ;;  %s34_s29 = int_to_ptr.hbm [resolvable:$true] %s33_s29 }
   0x4   :  { %17 = vsyncpa [#allocation4], 0  ;;  %s845_s30 = smov [#allocation5]   ;;  %s62_s12 = sshll.u32 %s932_s4, 4  ;;  %s63_s12 = int_to_ptr.hbm [resolvable:$true] %s62_s12 }
   0x5   :  { %s35_s9 = sshll.u32 %s845_s30, 4  ;;  %s846_s13 = smov 64   ;;  %s36_s9 = int_to_ptr.vmem [resolvable:$true] %s35_s9 }
   0x6   :  { %s847_s14 = smov 4   ;;  %s848_s15 = smov [#allocation8]  }
   0x7   :  { %41 = dma.hbm_to_vmem [thread:$0]  %s34_s29, 1024, %s36_s9, [#allocation6], %s846_s13, %s846_s13, %s847_s14  }
   0x8   :  { %s64_s16 = sshll.u32 %s848_s15, 4  ;;  %s23_s19 = sshll.u32 %s928_s0, 4  ;;  %s65_s16 = int_to_ptr.vmem [resolvable:$true] %s64_s16  ;;  %s24_s19 = int_to_ptr.hbm [resolvable:$true] %s23_s19 }
   0x9   :  { %67 = dma.hbm_to_vmem [thread:$0]  %s63_s12, 16, %s65_s16, [#allocation9]  }
   0xa   :  { %s48_s21 = sshll.u32 %s931_s3, 4  ;;  %s849_s22 = smov [#allocation2]   ;;  %s49_s21 = int_to_ptr.hbm [resolvable:$true] %s48_s21 }
   0xb   :  { %s25_s23 = sshll.u32 %s849_s22, 4  ;;  %s850_s4 = smov [#allocation7]   ;;  %s26_s23 = int_to_ptr.vmem [resolvable:$true] %s25_s23 }
   0xc   :  { %28 = dma.hbm_to_vmem [thread:$0]  %s24_s19, 128, %s26_s23, [#allocation3]  }
   0xd   :  { %s50_s24 = sshll.u32 %s850_s4, 4  ;;  %s72_s27 = sshll.u32 %s933_s5, 4  ;;  %s51_s24 = int_to_ptr.vmem [resolvable:$true] %s50_s24  ;;  %s73_s27 = int_to_ptr.hbm [resolvable:$true] %s72_s27 }
   0xe   :  { %56 = dma.hbm_to_vmem [thread:$0]  %s49_s21, 1024, %s51_s24, [#allocation6], %s846_s13, %s846_s13, %s847_s14  }
   0xf   :  { %s851_s0 = smov [#allocation10]   ;;  %s88_s3 = sshll.u32 %s935_s7, 4  ;;  %s89_s3 = int_to_ptr.hbm [resolvable:$true] %s88_s3 }
  0x10   :  { %s74_s28 = sshll.u32 %s851_s0, 4  ;;  %s852_s9 = smov 128   ;;  %s75_s28 = int_to_ptr.vmem [resolvable:$true] %s74_s28 }
  0x11   :  { %s853_s10 = smov 8   ;;  %s854_s11 = smov [#allocation11]  }
  0x12   :  { %80 = dma.hbm_to_vmem [thread:$0]  %s73_s27, 2048, %s75_s28, [#allocation9], %s852_s9, %s852_s9, %s853_s10  }
  0x13   :  { %s90_s12 = sshll.u32 %s854_s11, 4  ;;  %s91_s12 = int_to_ptr.vmem [resolvable:$true] %s90_s12 }
  0x14   :  { %93 = dma.hbm_to_vmem [thread:$0]  %s89_s3, 128, %s91_s12, [#allocation12]  }
  0x15   :  { %835 = dma.done.wait [#allocation3], 128  }
  0x16   :  { %836 = vsyncadd [#allocation3], 4294967168 }
  0x17   :  { %837 = dma.done.wait [#allocation6], 2048  }
  0x18   :  { %838 = vsyncadd [#allocation6], 4294965248 }
  0x19   :  { %839 = dma.done.wait [#allocation9], 2064  }
  0x1a   :  { %840 = vsyncadd [#allocation9], 4294965232 }
  0x1b   :  { %841 = dma.done.wait [#allocation12], 128  }
  0x1c   :  { %842 = vsyncadd [#allocation12], 4294967168  ;;  %v617_v0 = vld [vmem:[#allocation5 + $0x38] sm:$0xff]  ;;  %v616_v1 = vld [vmem:[#allocation5 + $0x30] sm:$0xff]  ;;  %s468_s17 = sshll.u32 %s936_s8, 4  ;;  %s469_s17 = int_to_ptr.hbm [resolvable:$true] %s468_s17 }
  0x1d   :  { %188 = vmatpush.bf16.msra.mxu0 %v617_v0  ;;  %v625_v2 = vld [vmem:[#allocation7 + $0x38] sm:$0xff]  ;;  %v624_v3 = vld [vmem:[#allocation7 + $0x30] sm:$0xff]  ;;  %v615_v4 = vld [vmem:[#allocation5 + $0x28] sm:$0xff] }
  0x1e   :  { %271 = vmatpush.bf16.msra.mxu1 %v625_v2  ;;  %v623_v5 = vld [vmem:[#allocation7 + $0x28] sm:$0xff]  ;;  %v614_v6 = vld [vmem:[#allocation5 + $0x20] sm:$0xff]  ;;  %v613_v8 = vld [vmem:[#allocation5 + $0x18] sm:$0xff] }
  0x1f   :  { %v622_v7 = vld [vmem:[#allocation7 + $0x20] sm:$0xff]  ;;  %v621_v9 = vld [vmem:[#allocation7 + $0x18] sm:$0xff]  ;;  %v612_v10 = vld [vmem:[#allocation5 + $0x10] sm:$0xff] }
  0x20   :  { %v620_v11 = vld [vmem:[#allocation7 + $0x10] sm:$0xff]  ;;  %v611_v12 = vld [vmem:[#allocation5 + $0x8] sm:$0xff]  ;;  %v610_v13 = vld [vmem:[#allocation5] sm:$0xff] }
  0x21   :  { %189 = vmatpush.bf16.msra.mxu0 %v616_v1  ;;  %v118_v14 = vld [vmem:[#allocation2] sm:$0xff]  ;;  %v619_v16 = vld [vmem:[#allocation7 + $0x8] sm:$0xff]  ;;  %v618_v17 = vld [vmem:[#allocation7] sm:$0xff] }
  0x22   :  { %272 = vmatpush.bf16.msra.mxu1 %v624_v3  ;;  %v119_v15 = vpack.c.bf16 %v118_v14, %v118_v14  ;;  %v603_v18 = vld [vmem:[#allocation10 + $0x70] sm:$0xf]  ;;  %v641_v19 = vld [vmem:[#allocation10 + $0x74] sm:$0xf0]  ;;  %v640_v20 = vld [vmem:[#allocation10 + $0x74] sm:$0xf] }
  0x23   :  { %v604_v21 = vor.u32 %v641_v19, %v603_v18  ;;  %v605_v22 = vld [vmem:[#allocation10 + $0x78] sm:$0xf0]  ;;  %v595_v23 = vld [vmem:[#allocation10 + $0x60] sm:$0xf]  ;;  %v639_v24 = vld [vmem:[#allocation10 + $0x64] sm:$0xf0] }
  0x24   :  { %v608_v25 = vor.u32 %v640_v20, %v605_v22  ;;  %v638_v26 = vld [vmem:[#allocation10 + $0x64] sm:$0xf]  ;;  %v597_v27 = vld [vmem:[#allocation10 + $0x68] sm:$0xf0]  ;;  %v596_v28 = vor.u32 %v639_v24, %v595_v23  ;;  %v587_v30 = vld [vmem:[#allocation10 + $0x50] sm:$0xf] }
  0x25   :  { %190 = vmatpush.bf16.msra.mxu0 %v615_v4  ;;  %388 = vmatpush.bf16.msra.mxu2 %v604_v21  ;;  %v600_v29 = vor.u32 %v638_v26, %v597_v27  ;;  %v637_v31 = vld [vmem:[#allocation10 + $0x54] sm:$0xf0]  ;;  %v636_v32 = vld [vmem:[#allocation10 + $0x54] sm:$0xf]  ;;  %v589_v33 = vld [vmem:[#allocation10 + $0x58] sm:$0xf0] }
  0x26   :  { %273 = vmatpush.bf16.msra.mxu1 %v623_v5  ;;  %401 = vmatpush.bf16.msra.mxu3 %v608_v25  ;;  %v588_v34 = vor.u32 %v637_v31, %v587_v30  ;;  %v592_v35 = vor.u32 %v636_v32, %v589_v33  ;;  %v579_v36 = vld [vmem:[#allocation10 + $0x40] sm:$0xf]  ;;  %v635_v37 = vld [vmem:[#allocation10 + $0x44] sm:$0xf0]  ;;  %v634_v38 = vld [vmem:[#allocation10 + $0x44] sm:$0xf] }
  0x27   :  { %v581_v39 = vld [vmem:[#allocation10 + $0x48] sm:$0xf0]  ;;  %v580_v40 = vor.u32 %v635_v37, %v579_v36  ;;  %v571_v42 = vld [vmem:[#allocation10 + $0x30] sm:$0xf]  ;;  %v633_v43 = vld [vmem:[#allocation10 + $0x34] sm:$0xf0] }
  0x28   :  { %v584_v41 = vor.u32 %v634_v38, %v581_v39  ;;  %v632_v44 = vld [vmem:[#allocation10 + $0x34] sm:$0xf]  ;;  %v573_v45 = vld [vmem:[#allocation10 + $0x38] sm:$0xf0]  ;;  %v572_v46 = vor.u32 %v633_v43, %v571_v42  ;;  %v563_v48 = vld [vmem:[#allocation10 + $0x20] sm:$0xf] }
  0x29   :  { %191 = vmatpush.bf16.msra.mxu0 %v614_v6  ;;  %389 = vmatpush.bf16.msra.mxu2 %v596_v28  ;;  %v576_v47 = vor.u32 %v632_v44, %v573_v45  ;;  %v631_v49 = vld [vmem:[#allocation10 + $0x24] sm:$0xf0]  ;;  %v630_v50 = vld [vmem:[#allocation10 + $0x24] sm:$0xf]  ;;  %v565_v51 = vld [vmem:[#allocation10 + $0x28] sm:$0xf0] }
  0x2a   :  { %274 = vmatpush.bf16.msra.mxu1 %v622_v7  ;;  %402 = vmatpush.bf16.msra.mxu3 %v600_v29  ;;  %v564_v52 = vor.u32 %v631_v49, %v563_v48  ;;  %v568_v53 = vor.u32 %v630_v50, %v565_v51  ;;  %v653_v54 = vld [vmem:[%s930_s2] ss:$0 sm:$0xff]  ;;  %v555_v60 = vld [vmem:[#allocation10 + $0x10] sm:$0xf]  ;;  %v629_v61 = vld [vmem:[#allocation10 + $0x14] sm:$0xf0] }
  0x2b   :  { %v628_v62 = vld [vmem:[#allocation10 + $0x14] sm:$0xf]  ;;  %v556_v63 = vor.u32 %v629_v61, %v555_v60  ;;  %v557_v0 = vld [vmem:[#allocation10 + $0x18] sm:$0xf0]  ;;  %v547_v2 = vld [vmem:[#allocation10] sm:$0xf] }
  0x2c   :  { %v560_v1 = vor.u32 %v628_v62, %v557_v0  ;;  %v627_v3 = vld [vmem:[#allocation10 + $0x4] sm:$0xf0]  ;;  %v626_v4 = vld [vmem:[#allocation10 + $0x4] sm:$0xf]  ;;  %v549_v6 = vld [vmem:[#allocation10 + $0x8] sm:$0xf0] }
  0x2d   :  { %192 = vmatpush.bf16.msra.mxu0 %v613_v8  ;;  %390 = vmatpush.bf16.msra.mxu2 %v588_v34  ;;  %v548_v5 = vor.u32 %v627_v3, %v547_v2  ;;  %v552_v7 = vor.u32 %v626_v4, %v549_v6  ;;  %v654_v8 = vld [vmem:[#allocation8] ss:$0 sm:$0xff]  ;;  %v302_v14 = vld [vmem:[%s934_s6] sm:$0x3]  ;;  %s855_s6 = smov [#allocation13]  }
  0x2e   :  { %275 = vmatpush.bf16.msra.mxu1 %v621_v9  ;;  %403 = vmatpush.bf16.msra.mxu3 %v592_v35  ;;  %v304_v32 = vperm.slane %v302_v14, 0  ;;  %v429_v35 = vld [vmem:[#allocation11] sm:$0xff]  ;;  %s466_s14 = sshll.u32 %s855_s6, 4  ;;  %s467_s14 = int_to_ptr.vmem [resolvable:$true] %s466_s14 }
  0x2f   :  { %v432_v48 = vmul.f32 -0.5, %v429_v35 }
  0x31   :  { %193 = vmatpush.bf16.msra.mxu0 %v612_v10  ;;  %391 = vmatpush.bf16.msra.mxu2 %v580_v40 }
  0x32   :  { %276 = vmatpush.bf16.msra.mxu1 %v620_v11  ;;  %404 = vmatpush.bf16.msra.mxu3 %v584_v41 }
  0x35   :  { %194 = vmatpush.bf16.msra.mxu0 %v611_v12  ;;  %392 = vmatpush.bf16.msra.mxu2 %v572_v46 }
  0x36   :  { %277 = vmatpush.bf16.msra.mxu1 %v619_v16  ;;  %405 = vmatpush.bf16.msra.mxu3 %v576_v47 }
  0x39   :  { %195 = vmatpush.bf16.msra.mxu0 %v610_v13  ;;  %393 = vmatpush.bf16.msra.mxu2 %v564_v52 }
  0x3a   :  { %278 = vmatpush.bf16.msra.mxu1 %v618_v17  ;;  %406 = vmatpush.bf16.msra.mxu3 %v568_v53  ;;  %v433_v53 = vmul.f32 %v432_v48, %v429_v35 }
  0x3c   :  { %196 = vmatmul.bf16.vlgmr.msra.gmra.mxu0 %v119_v15  ;;  %v305_v15 = vperm.slane %v302_v14, 1 }
  0x3d   :  { %394 = vmatpush.bf16.msra.mxu2 %v556_v63 }
  0x3e   :  { %407 = vmatpush.bf16.msra.mxu3 %v560_v1 }
  0x41   :  { %395 = vmatpush.bf16.msra.mxu2 %v548_v5 }
  0x42   :  { %408 = vmatpush.bf16.msra.mxu3 %v552_v7 }
  0xb9   :  { %v197_v55 = vpop.f32.mrf.mxu0 }
  0xba   :  { %v198_v56 = vadd.f32 %v653_v54, %v197_v55 }
  0xbc   :  { %v201_v57 = vmax.f32 %v198_v56, 0.0 }
  0xbe   :  { %v202_v58 = vpack.c.bf16 %v201_v57, %v201_v57 }
  0xc0   :  { %279 = vmatmul.bf16.vlgmr.msra.gmra.mxu1 %v202_v58 }
  0xc1   :  { %v199_v59 = vpop.f32.mrf.mxu0 }
 0x13d   :  { %v280_v9 = vpop.f32.mrf.mxu1 }
 0x13e   :  { %v281_v10 = vadd.f32 %v654_v8, %v280_v9 }
 0x140   :  { %v284_v11 = vmax.f32 %v281_v10, 0.0 }
 0x142   :  { %v285_v12 = vpack.c.bf16 %v284_v11, %v284_v11 }
 0x144   :  { %396 = vmatmul.bf16.vlgmr.msra.gmra.mxu2 %v285_v12  ;;  %409 = vmatmul.bf16.vlgmr.msra.gmra.mxu3 %v285_v12 }
 0x145   :  { %v282_v13 = vpop.f32.mrf.mxu1 }
 0x1c7   :  { %v397_v16 = vpop.f32.mrf.mxu2  ;;  %v410_v17 = vpop.f32.mrf.mxu3 }
 0x1c8   :  { %v411_v18 = vadd.f32 %v410_v17, %v305_v15  ;;  %v398_v37 = vadd.f32 %v397_v16, %v304_v32 }
 0x1ca   :  { %v415_v19 = vand.u32 2147483647, %v411_v18  ;;  %v414_v33 = vmax.f32 %v411_v18, 0.0 }
 0x1cc   :  { %v416_v20 = vsub.f32 0.0, %v415_v19 }
 0x1ce   :  { %v417_v21 = vmul.f32 1.442695, %v416_v20 }
 0x1cf   :  { %v399_v22 = vpop.f32.mrf.mxu2  ;;  %v412_v23 = vpop.f32.mrf.mxu3 }
 0x1d0   :  { %655 = vpow2.f32 %v417_v21 }
 0x1d6   :  { %v656_v24 = vpop.eup %655 }
 0x1d7   :  { %v419_v25 = vadd.f32 1.0, %v656_v24  ;;  %v422_v26 = vmul.f32 -0.5, %v656_v24  ;;  %v425_v28 = vand.u32 2147483647, %v656_v24 }
 0x1d9   :  { %657 = vlog2.f32 %v419_v25  ;;  %v423_v27 = vadd.f32 1.0, %v422_v26  ;;  %vm426_vm0 = vcmp.lt.f32.partialorder %v425_v28, 0.0004427343 }
 0x1db   :  { %v424_v31 = vmul.f32 %v656_v24, %v423_v27 }
 0x1df   :  { %v658_v29 = vpop.eup %657 }
 0x1e0   :  { %v421_v30 = vmul.f32 0.6931472, %v658_v29 }
 0x1e2   :  { %v427_v34 = vsel %vm426_vm0, %v424_v31, %v421_v30 }
 0x1e3   :  { %v428_v36 = vadd.f32 %v427_v34, %v414_v33 }
 0x1e5   :  { %v430_v38 = vmul.f32 %v429_v35, %v428_v36 }
 0x1e7   :  { %v431_v39 = vadd.f32 %v430_v38, %v398_v37 }
 0x1e9   :  { %v440_v40 = vmul.f32 -2.0, %v431_v39  ;;  %659 = vtanh.f32 %v431_v39  ;;  %v439_v60 = vsub.f32 0.6931472, %v431_v39 }
 0x1eb   :  { %v442_v41 = vand.u32 2147483647, %v440_v40  ;;  %v441_v57 = vmax.f32 %v440_v40, 0.0 }
 0x1ed   :  { %v443_v42 = vsub.f32 0.0, %v442_v41 }
 0x1ef   :  { %v660_v43 = vpop.eup %659  ;;  %v444_v44 = vmul.f32 1.442695, %v443_v42 }
 0x1f0   :  { %459 = vst [vmem:[#allocation13] sm:$0xff] %v660_v43 }
 0x1f1   :  { %661 = vpow2.f32 %v444_v44 }
 0x1f2   :  { %663 = vlog2.f32 %v428_v36 }
 0x1f7   :  { %v662_v45 = vpop.eup %661 }
 0x1f8   :  { %v446_v46 = vadd.f32 1.0, %v662_v45  ;;  %v449_v47 = vmul.f32 -0.5, %v662_v45  ;;  %v664_v49 = vpop.eup %663  ;;  %v452_v51 = vand.u32 2147483647, %v662_v45 }
 0x1f9   :  { %v435_v54 = vmul.f32 0.6931472, %v664_v49 }
 0x1fa   :  { %665 = vlog2.f32 %v446_v46  ;;  %v450_v50 = vadd.f32 1.0, %v449_v47  ;;  %vm453_vm1 = vcmp.lt.f32.partialorder %v452_v51, 0.0004427343 }
 0x1fb   :  { %v436_v59 = vsub.f32 %v433_v53, %v435_v54 }
 0x1fc   :  { %v451_v56 = vmul.f32 %v662_v45, %v450_v50 }
 0x1fd   :  { %v609_v63 = vadd.f32 -0.9189385, %v436_v59 }
 0x200   :  { %v666_v52 = vpop.eup %665 }
 0x201   :  { %v448_v55 = vmul.f32 0.6931472, %v666_v52 }
 0x203   :  { %v454_v58 = vsel %vm453_vm1, %v451_v56, %v448_v55 }
 0x204   :  { %v455_v61 = vadd.f32 %v454_v58, %v441_v57 }
 0x206   :  { %v456_v62 = vsub.f32 %v439_v60, %v455_v61 }
 0x208   :  { %v457_v0 = vmul.f32 2.0, %v456_v62 }
 0x20a   :  { %v458_v1 = vsub.f32 %v609_v63, %v457_v0 }
 0x20c   :  { %460 = vst [vmem:[#allocation13 + $0x8] sm:$0xff] %v458_v1 }
 0x20d   :  { %471 = dma.vmem_to_hbm [thread:$0]  %s467_s14, 256, %s469_s17, [#allocation4]  }
 0x20e   :  { %843 = dma.done.wait [#allocation4], 256  }
 0x20f   :  { %844 = vsyncadd [#allocation4], 4294967040 }
 0x210   :  { %476 = vsyncpa [#allocation3], 1 }
 0x211   :  { %477 = vsyncpa [#allocation6], 1 }
 0x212   :  { %478 = vsyncpa [#allocation9], 1 }
 0x213   :  { %479 = vsyncpa [#allocation12], 1 }
 0x214   :  { %480 = vsyncpa [#allocation4], 1 }

</bundles_post_ra>
